<compile_context>
chip_gen: v7x
topology: tpu7x:2x2x1
jax: 0.10.0
libtpu: 0.0.40
codegen_flags: <defaults>
</compile_context>

<pallas_src>
import functools

import jax
import jax.numpy as jnp
from jax import lax
from jax.experimental import pallas as pl
from jax.experimental.pallas import tpu as pltpu

IN_FEATURES = 4
HIDDEN = 64
OUT_FEATURES = 3
SUB_ROWS = 256   # rows per inner sub-tile (bounds vreg live ranges)


def residual_mlp_kernel(x_ref, w1_ref, b1_ref, w2_ref, b2_ref,
                        w3_ref, b3_ref, w4_ref, b4_ref, o_ref,
                        *, sub_rows, n_sub):
    # Weights/biases are small and VMEM-resident; load once per grid step.
    w1 = w1_ref[...]; b1 = b1_ref[...]
    w2 = w2_ref[...]; b2 = b2_ref[...]
    w3 = w3_ref[...]; b3 = b3_ref[...]
    w4 = w4_ref[...]; b4 = b4_ref[...]

    def sub_tile(s, carry):
        r0 = pl.multiple_of(s * sub_rows, sub_rows)
        x = x_ref[pl.ds(r0, sub_rows), :]                     # (sub, 4) f32

        # fc1: K=4 matmul on the (otherwise idle) MXU, f32 in/out.
        h1 = jnp.tanh(jnp.dot(x, w1, preferred_element_type=jnp.float32) + b1)

        # fc2 / fc3: bf16 MXU inputs, f32 accumulation; residual stays f32.
        h2 = jnp.tanh(jnp.dot(h1.astype(jnp.bfloat16), w2,
                              preferred_element_type=jnp.float32) + b2)
        h3 = jnp.tanh(jnp.dot(h2.astype(jnp.bfloat16), w3,
                              preferred_element_type=jnp.float32) + b3) + h1

        # fc4: 3-wide output stored directly (cheap masked store; keeps the
        # output DMA narrow -- 12 B/row instead of 512 B/row).
        out = jnp.dot(h3.astype(jnp.bfloat16), w4,
                      preferred_element_type=jnp.float32) + b4
        o_ref[pl.ds(r0, sub_rows), :] = out.astype(o_ref.dtype)
        return carry

    lax.fori_loop(0, n_sub, sub_tile, 0, unroll=True)


def _round_up(a, m):
    return (a + m - 1) // m * m


def _choose_tile(batch, block_rows):
    tb = min(block_rows, _round_up(batch, 8))
    if tb > SUB_ROWS:
        tb = _round_up(tb, SUB_ROWS)
        # v7x megacore: keep at least two grid steps when the batch is big
        # enough so the "parallel" axis can shard across both TensorCores.
        if batch > 2 * SUB_ROWS and _round_up(batch, tb) <= tb:
            tb = _round_up((batch + 1) // 2, SUB_ROWS)
    return tb


def residual_net_forward(x, params, *, block_rows=2048):
    """Forward pass matching residualNetBigData. Weights stored as (in, out) = torch W^T."""
    w1, b1, w2, b2, w3, b3, w4, b4 = params

    # x[:, :4]: only materialize a slice when the source is wider than 4; the
    # common/test case (F == 4) is read directly by the BlockSpec DMA.
    if x.shape[1] != IN_FEATURES:
        # TODO(synk): fold this column slice into the BlockSpec DMA when the
        # source feature width permits a legal (tb, 4) block.
        x = x[:, :IN_FEATURES]
    x = x.astype(jnp.float32)
    B = x.shape[0]

    # Cast the MXU weights to bf16 once (outside the grid loop).
    w2_b = w2.astype(jnp.bfloat16)
    w3_b = w3.astype(jnp.bfloat16)
    w4_b = w4.astype(jnp.bfloat16)

    tb = _choose_tile(B, block_rows)
    sub = min(SUB_ROWS, tb)
    n_sub = tb // sub
    b_pad = _round_up(B, tb)
    if b_pad != B:
        x = jnp.pad(x, ((0, b_pad - B), (0, 0)))
    grid = (b_pad // tb,)

    const = lambda shape: pl.BlockSpec(shape, lambda i: (0, 0))  # VMEM-resident operand

    cost = pl.CostEstimate(
        flops=2 * b_pad * (IN_FEATURES * HIDDEN + 2 * HIDDEN * HIDDEN
                           + HIDDEN * OUT_FEATURES),
        transcendentals=3 * b_pad * HIDDEN,
        bytes_accessed=(b_pad * IN_FEATURES * 4 + b_pad * OUT_FEATURES * 4
                        + w1.size * 4 + b1.size * 4
                        + w2_b.size * 2 + b2.size * 4
                        + w3_b.size * 2 + b3.size * 4
                        + w4_b.size * 2 + b4.size * 4),
    )

    kernel = functools.partial(residual_mlp_kernel, sub_rows=sub, n_sub=n_sub)

    out = pl.pallas_call(
        kernel,
        out_shape=jax.ShapeDtypeStruct((b_pad, OUT_FEATURES), jnp.float32),
        grid=grid,
        in_specs=[
            pl.BlockSpec((tb, IN_FEATURES), lambda i: (i, 0)),
            const(w1.shape), const(b1.shape),
            const(w2_b.shape), const(b2.shape),
            const(w3_b.shape), const(b3.shape),
            const(w4_b.shape), const(b4.shape),
        ],
        out_specs=pl.BlockSpec((tb, OUT_FEATURES), lambda i: (i, 0)),
        compiler_params=pltpu.CompilerParams(
            dimension_semantics=("parallel",),
            vmem_limit_bytes=32 * 1024 * 1024,
        ),
        cost_estimate=cost,
    )(x, w1, b1, w2_b, b2, w3_b, b3, w4_b, b4)

    return out[:B]  # pure row trim; no column slice of a padded array


def init_params(key):
    """Mirrors the PyTorch module: xavier_uniform_ weights, default U(-1/sqrt(fan_in), +) biases."""
    def xavier_uniform(k, fan_in, fan_out):
        bound = (6.0 / (fan_in + fan_out)) ** 0.5
        return jax.random.uniform(k, (fan_in, fan_out), jnp.float32, -bound, bound)

    def bias_default(k, fan_in, fan_out):
        bound = 1.0 / (fan_in ** 0.5)
        return jax.random.uniform(k, (1, fan_out), jnp.float32, -bound, bound)

    ks = jax.random.split(key, 8)
    w1 = xavier_uniform(ks[0], IN_FEATURES, HIDDEN)
    b1 = bias_default(ks[1], IN_FEATURES, HIDDEN)
    w2 = xavier_uniform(ks[2], HIDDEN, HIDDEN)
    b2 = bias_default(ks[3], HIDDEN, HIDDEN)
    w3 = xavier_uniform(ks[4], HIDDEN, HIDDEN)
    b3 = bias_default(ks[5], HIDDEN, HIDDEN)
    w4 = xavier_uniform(ks[6], HIDDEN, OUT_FEATURES)
    b4 = bias_default(ks[7], HIDDEN, OUT_FEATURES)
    return (w1, b1, w2, b2, w3, b3, w4, b4)


def reference_forward(x, params):
    w1, b1, w2, b2, w3, b3, w4, b4 = params
    x = x[:, :IN_FEATURES]
    h1 = jnp.tanh(x @ w1 + b1)
    h2 = jnp.tanh(h1 @ w2 + b2)
    h3 = jnp.tanh(h2 @ w3 + b3) + h1
    return h3 @ w4 + b4


if __name__ == "__main__":
    key = jax.random.PRNGKey(0)
    k_params, k_x = jax.random.split(key)
    params = init_params(k_params)

    B = 8  # small batch for the smoke test
    x = jax.random.normal(k_x, (B, IN_FEATURES), jnp.float32)

    out = residual_net_forward(x, params)
    out = jax.block_until_ready(out)

    ref = reference_forward(x, params)
    assert out.shape == (B, OUT_FEATURES), out.shape
    # bf16 MXU inputs for fc2/fc3/fc4 (f32 accumulation) -> loosened tolerance
    # vs the pure-f32 reference.
    assert jnp.allclose(out, ref, atol=3e-2, rtol=3e-2), "mismatch vs JAX reference"

    print("KERNEL_OK")
</pallas_src>

<mosaic_0001>
module attributes {stable_mosaic.version = 11 : i64} {
  func.func @residual_mlp_kernel(%arg0: i32, %arg1: memref<8x4xf32, #tpu.memory_space<vmem>>, %arg2: memref<4x64xf32, #tpu.memory_space<vmem>>, %arg3: memref<1x64xf32, #tpu.memory_space<vmem>>, %arg4: memref<64x64xbf16, #tpu.memory_space<vmem>>, %arg5: memref<1x64xf32, #tpu.memory_space<vmem>>, %arg6: memref<64x64xbf16, #tpu.memory_space<vmem>>, %arg7: memref<1x64xf32, #tpu.memory_space<vmem>>, %arg8: memref<64x3xbf16, #tpu.memory_space<vmem>>, %arg9: memref<1x3xf32, #tpu.memory_space<vmem>>, %arg10: memref<8x3xf32, #tpu.memory_space<vmem>>) attributes {dimension_semantics = [#tpu.dimension_semantics<parallel>], iteration_bounds = array<i64: 1>, scalar_prefetch = 0 : i64, scratch_operands = 0 : i64, tpu.core_type = #tpu.core_type<tc>, window_params = [{transform_indices = @transform_0, window_bounds = array<i64: 8, 4>}, {pipeline_mode = #tpu.pipeline_mode<synchronous>, transform_indices = @transform_1, window_bounds = array<i64: 4, 64>}, {pipeline_mode = #tpu.pipeline_mode<synchronous>, transform_indices = @transform_2, window_bounds = array<i64: 1, 64>}, {pipeline_mode = #tpu.pipeline_mode<synchronous>, transform_indices = @transform_3, window_bounds = array<i64: 64, 64>}, {pipeline_mode = #tpu.pipeline_mode<synchronous>, transform_indices = @transform_4, window_bounds = array<i64: 1, 64>}, {pipeline_mode = #tpu.pipeline_mode<synchronous>, transform_indices = @transform_5, window_bounds = array<i64: 64, 64>}, {pipeline_mode = #tpu.pipeline_mode<synchronous>, transform_indices = @transform_6, window_bounds = array<i64: 1, 64>}, {pipeline_mode = #tpu.pipeline_mode<synchronous>, transform_indices = @transform_7, window_bounds = array<i64: 64, 3>}, {pipeline_mode = #tpu.pipeline_mode<synchronous>, transform_indices = @transform_8, window_bounds = array<i64: 1, 3>}, {transform_indices = @transform_9, window_bounds = array<i64: 8, 3>}]} {
    %c0 = arith.constant 0 : index
    %c0_0 = arith.constant 0 : index
    %0 = vector.load %arg2[%c0, %c0_0] : memref<4x64xf32, #tpu.memory_space<vmem>>, vector<4x64xf32>
    %c0_1 = arith.constant 0 : index
    %c0_2 = arith.constant 0 : index
    %1 = vector.load %arg3[%c0_1, %c0_2] : memref<1x64xf32, #tpu.memory_space<vmem>>, vector<1x64xf32>
    %c0_3 = arith.constant 0 : index
    %c0_4 = arith.constant 0 : index
    %2 = vector.load %arg4[%c0_3, %c0_4] : memref<64x64xbf16, #tpu.memory_space<vmem>>, vector<64x64xbf16>
    %c0_5 = arith.constant 0 : index
    %c0_6 = arith.constant 0 : index
    %3 = vector.load %arg5[%c0_5, %c0_6] : memref<1x64xf32, #tpu.memory_space<vmem>>, vector<1x64xf32>
    %c0_7 = arith.constant 0 : index
    %c0_8 = arith.constant 0 : index
    %4 = vector.load %arg6[%c0_7, %c0_8] : memref<64x64xbf16, #tpu.memory_space<vmem>>, vector<64x64xbf16>
    %c0_9 = arith.constant 0 : index
    %c0_10 = arith.constant 0 : index
    %5 = vector.load %arg7[%c0_9, %c0_10] : memref<1x64xf32, #tpu.memory_space<vmem>>, vector<1x64xf32>
    %c0_11 = arith.constant 0 : index
    %c0_12 = arith.constant 0 : index
    %6 = vector.load %arg8[%c0_11, %c0_12] : memref<64x3xbf16, #tpu.memory_space<vmem>>, vector<64x3xbf16>
    %c0_13 = arith.constant 0 : index
    %c0_14 = arith.constant 0 : index
    %7 = vector.load %arg9[%c0_13, %c0_14] : memref<1x3xf32, #tpu.memory_space<vmem>>, vector<1x3xf32>
    %c0_i32 = arith.constant 0 : i32
    %c8_i32 = arith.constant 8 : i32
    %8 = arith.muli %c0_i32, %c8_i32 : i32
    %9 = tpu.assume_multiple %8, 8 : i32
    %10 = arith.index_cast %9 : i32 to index
    %c0_15 = arith.constant 0 : index
    %11 = vector.load %arg1[%10, %c0_15] : memref<8x4xf32, #tpu.memory_space<vmem>>, vector<8x4xf32>
    %cst = arith.constant dense<0.000000e+00> : vector<8x64xf32>
    %12 = tpu.matmul %11, %0, %cst {dimension_numbers = #tpu.dot_dimension_numbers<[1], [0], [0], [1], [0, 0, 1, 1], [], []>} : vector<8x4xf32>, vector<4x64xf32>, vector<8x64xf32> -> vector<8x64xf32>
    %13 = vector.broadcast %1 : vector<1x64xf32> to vector<8x64xf32>
    %14 = arith.addf %12, %13 : vector<8x64xf32>
    %15 = math.tanh %14 : vector<8x64xf32>
    %16 = arith.truncf %15 : vector<8x64xf32> to vector<8x64xbf16>
    %cst_16 = arith.constant dense<0.000000e+00> : vector<8x64xf32>
    %17 = tpu.matmul %16, %2, %cst_16 {dimension_numbers = #tpu.dot_dimension_numbers<[1], [0], [0], [1], [0, 0, 1, 1], [], []>} : vector<8x64xbf16>, vector<64x64xbf16>, vector<8x64xf32> -> vector<8x64xf32>
    %18 = vector.broadcast %3 : vector<1x64xf32> to vector<8x64xf32>
    %19 = arith.addf %17, %18 : vector<8x64xf32>
    %20 = math.tanh %19 : vector<8x64xf32>
    %21 = arith.truncf %20 : vector<8x64xf32> to vector<8x64xbf16>
    %cst_17 = arith.constant dense<0.000000e+00> : vector<8x64xf32>
    %22 = tpu.matmul %21, %4, %cst_17 {dimension_numbers = #tpu.dot_dimension_numbers<[1], [0], [0], [1], [0, 0, 1, 1], [], []>} : vector<8x64xbf16>, vector<64x64xbf16>, vector<8x64xf32> -> vector<8x64xf32>
    %23 = vector.broadcast %5 : vector<1x64xf32> to vector<8x64xf32>
    %24 = arith.addf %22, %23 : vector<8x64xf32>
    %25 = math.tanh %24 : vector<8x64xf32>
    %26 = arith.addf %25, %15 : vector<8x64xf32>
    %27 = arith.truncf %26 : vector<8x64xf32> to vector<8x64xbf16>
    %cst_18 = arith.constant dense<0.000000e+00> : vector<8x3xf32>
    %28 = tpu.matmul %27, %6, %cst_18 {dimension_numbers = #tpu.dot_dimension_numbers<[1], [0], [0], [1], [0, 0, 1, 1], [], []>} : vector<8x64xbf16>, vector<64x3xbf16>, vector<8x3xf32> -> vector<8x3xf32>
    %29 = vector.broadcast %7 : vector<1x3xf32> to vector<8x3xf32>
    %30 = arith.addf %28, %29 : vector<8x3xf32>
    %31 = arith.index_cast %9 : i32 to index
    %c0_19 = arith.constant 0 : index
    %32 = vector.load %arg10[%31, %c0_19] : memref<8x3xf32, #tpu.memory_space<vmem>>, vector<8x3xf32>
    tpu.vector_store %arg10[%31, %c0_19], %30 {strides = array<i32>} : memref<8x3xf32, #tpu.memory_space<vmem>>, vector<8x3xf32>,
    %c1_i32 = arith.constant 1 : i32
    return
  }
  func.func @transform_0(%arg0: i32) -> (i32, i32) {
    %c0_i32 = arith.constant 0 : i32
    %c0_i32_0 = arith.constant 0 : i32
    return %arg0, %c0_i32 : i32, i32
  }
  func.func @transform_1(%arg0: i32) -> (i32, i32) {
    %c0_i32 = arith.constant 0 : i32
    %c0_i32_0 = arith.constant 0 : i32
    %c0_i32_1 = arith.constant 0 : i32
    return %c0_i32, %c0_i32_0 : i32, i32
  }
  func.func @transform_2(%arg0: i32) -> (i32, i32) {
    %c0_i32 = arith.constant 0 : i32
    %c0_i32_0 = arith.constant 0 : i32
    %c0_i32_1 = arith.constant 0 : i32
    return %c0_i32, %c0_i32_0 : i32, i32
  }
  func.func @transform_3(%arg0: i32) -> (i32, i32) {
    %c0_i32 = arith.constant 0 : i32
    %c0_i32_0 = arith.constant 0 : i32
    %c0_i32_1 = arith.constant 0 : i32
    return %c0_i32, %c0_i32_0 : i32, i32
  }
  func.func @transform_4(%arg0: i32) -> (i32, i32) {
    %c0_i32 = arith.constant 0 : i32
    %c0_i32_0 = arith.constant 0 : i32
    %c0_i32_1 = arith.constant 0 : i32
    return %c0_i32, %c0_i32_0 : i32, i32
  }
  func.func @transform_5(%arg0: i32) -> (i32, i32) {
    %c0_i32 = arith.constant 0 : i32
    %c0_i32_0 = arith.constant 0 : i32
    %c0_i32_1 = arith.constant 0 : i32
    return %c0_i32, %c0_i32_0 : i32, i32
  }
  func.func @transform_6(%arg0: i32) -> (i32, i32) {
    %c0_i32 = arith.constant 0 : i32
    %c0_i32_0 = arith.constant 0 : i32
    %c0_i32_1 = arith.constant 0 : i32
    return %c0_i32, %c0_i32_0 : i32, i32
  }
  func.func @transform_7(%arg0: i32) -> (i32, i32) {
    %c0_i32 = arith.constant 0 : i32
    %c0_i32_0 = arith.constant 0 : i32
    %c0_i32_1 = arith.constant 0 : i32
    return %c0_i32, %c0_i32_0 : i32, i32
  }
  func.func @transform_8(%arg0: i32) -> (i32, i32) {
    %c0_i32 = arith.constant 0 : i32
    %c0_i32_0 = arith.constant 0 : i32
    %c0_i32_1 = arith.constant 0 : i32
    return %c0_i32, %c0_i32_0 : i32, i32
  }
  func.func @transform_9(%arg0: i32) -> (i32, i32) {
    %c0_i32 = arith.constant 0 : i32
    %c0_i32_0 = arith.constant 0 : i32
    return %arg0, %c0_i32 : i32, i32
  }
}

</mosaic_0001>

<bundles_post_ra>
// kernel: tpu_custom_call.1
= control target key start
LH: loop header
LB: loop body
LE: loop exit
PB: predicated region body
PF: predicated region fallthrough
CT: control target
= control target key end

     0   :  { %14 = vsyncpa [#allocation3], 0  ;;  %s752_s0 = inlined_call_operand.vmem [shape: f32[8,4], index: 0, kind: input, shape index: {}]   ;;  %s753_s1 = inlined_call_operand.hbm [shape: f32[4,64], index: 1, kind: input, shape index: {}]   ;;  %s754_s2 = inlined_call_operand.hbm [shape: f32[1,64], index: 2, kind: input, shape index: {}]   ;;  %s755_s3 = inlined_call_operand.vmem [shape: bf16[64,64], index: 3, kind: input, shape index: {}]   ;;  %s756_s4 = inlined_call_operand.hbm [shape: f32[1,64], index: 4, kind: input, shape index: {}]   ;;  %s757_s5 = inlined_call_operand.vmem [shape: bf16[64,64], index: 5, kind: input, shape index: {}]   ;;  %s758_s6 = inlined_call_operand.vmem [shape: f32[1,64], index: 6, kind: input, shape index: {}]   ;;  %s759_s7 = inlined_call_operand.vmem [shape: bf16[64,3], index: 7, kind: input, shape index: {}]   ;;  %s760_s8 = inlined_call_operand.vmem [shape: f32[1,3], index: 8, kind: input, shape index: {}]   ;;  %s761_s9 = inlined_call_operand.vmem [shape: f32[8,3], index: 9, kind: output, shape index: {}]  }
   0x1   :  { %15 = vsyncpa [#allocation5], 0  ;;  %s589_s30 = smov [#allocation4]   ;;  %s590_s11 = smov [#allocation2]  }
   0x2   :  { %s34_s10 = sshll.u32 %s589_s30, 4  ;;  %s24_s12 = sshll.u32 %s590_s11, 4  ;;  %s35_s10 = int_to_ptr.vmem [resolvable:$true] %s34_s10  ;;  %s25_s12 = int_to_ptr.vmem [resolvable:$true] %s24_s12 }
   0x3   :  { %s519_s15 = scalar_lea.hbm %s754_s2, 16 }
   0x4   :  { %p520_p0 = scmp.ne.s32.totalorder %s754_s2, %s519_s15  ;;  %p523_p1 = scmp.lt.u32.totalorder %s519_s15, %s754_s2 }
   0x6   :  { %p525_p2 = pnand %p523_p1, %p520_p0 }
   0x8   :  { %528 = shalt.err (!%p525_p2)
}
   0x9   :  { %s529_s20 = scalar_lea.vmem %s35_s10, 16  ;;  %s533_s21 = scalar_lea.vmem %s35_s10, 32 }
   0xa   :  { %p530_p3 = scmp.ne.s32.totalorder %s35_s10, %s529_s20  ;;  %p534_p4 = scmp.lt.s32.totalorder %s35_s10, %s35_s10 }
   0xb   :  { %p535_p5 = scmp.lt.s32.totalorder %s533_s21, %s529_s20 }
   0xd   :  { %p536_p6 = por %p535_p5, %p534_p4 }
   0xf   :  { %p537_p7 = pnand %p536_p6, %p530_p3 }
  0x11   :  { %540 = shalt.err (!%p537_p7)
}
  0x12   :  { %37 = dma.hbm_to_vmem [thread:$0]  %s754_s2, 16, %s35_s10, [#allocation5]  }
  0x13   :  { %s541_s26 = scalar_lea.hbm %s753_s1, 64 }
  0x14   :  { %p542_p8 = scmp.ne.s32.totalorder %s753_s1, %s541_s26  ;;  %p545_p9 = scmp.lt.u32.totalorder %s541_s26, %s753_s1 }
  0x16   :  { %p547_p10 = pnand %p545_p9, %p542_p8 }
  0x18   :  { %550 = shalt.err (!%p547_p10)
}
  0x19   :  { %s551_s11 = scalar_lea.vmem %s25_s12, 64  ;;  %p556_p12 = scmp.lt.s32.totalorder %s25_s12, %s25_s12 }
  0x1a   :  { %p552_p11 = scmp.ne.s32.totalorder %s25_s12, %s551_s11  ;;  %p557_p13 = scmp.lt.s32.totalorder %s551_s11, %s551_s11 }
  0x1c   :  { %p558_p0 = por %p557_p13, %p556_p12 }
  0x1e   :  { %p559_p1 = pnand %p558_p0, %p552_p11 }
  0x20   :  { %562 = shalt.err (!%p559_p1)
}
  0x21   :  { %27 = dma.hbm_to_vmem [thread:$0]  %s753_s1, 64, %s25_s12, [#allocation3]  }
  0x22   :  { %s591_s13 = smov [#allocation6]   ;;  %s563_s17 = scalar_lea.hbm %s756_s4, 16 }
  0x23   :  { %s46_s14 = sshll.u32 %s591_s13, 4  ;;  %p564_p2 = scmp.ne.s32.totalorder %s756_s4, %s563_s17  ;;  %s47_s14 = int_to_ptr.vmem [resolvable:$true] %s46_s14 }
  0x24   :  { %p567_p3 = scmp.lt.u32.totalorder %s563_s17, %s756_s4 }
  0x26   :  { %p569_p4 = pnand %p567_p3, %p564_p2 }
  0x28   :  { %572 = shalt.err (!%p569_p4)
}
  0x29   :  { %s573_s22 = scalar_lea.vmem %s47_s14, 16  ;;  %s577_s1 = scalar_lea.vmem %s47_s14, 32 }
  0x2a   :  { %p574_p5 = scmp.ne.s32.totalorder %s47_s14, %s573_s22  ;;  %p578_p6 = scmp.lt.s32.totalorder %s47_s14, %s47_s14 }
  0x2b   :  { %p579_p7 = scmp.lt.s32.totalorder %s577_s1, %s573_s22 }
  0x2d   :  { %p580_p8 = por %p579_p7, %p578_p6 }
  0x2f   :  { %p581_p9 = pnand %p580_p8, %p574_p5 }
  0x31   :  { %584 = shalt.err (!%p581_p9)
}
  0x32   :  { %49 = dma.hbm_to_vmem [thread:$0]  %s756_s4, 16, %s47_s14, [#allocation5]  }
  0x33   :  { %585 = dma.done.wait [#allocation3], 64  }
  0x34   :  { %586 = vsyncadd [#allocation3], 4294967232 }
  0x35   :  { %587 = dma.done.wait [#allocation5], 32  }
  0x36   :  { %588 = vsyncadd [#allocation5], 4294967264  ;;  %v592_v0 = vmov 0.0   ;;  %vm593_vm0 = vmmov 0   ;;  %vm108_vm1 = vcmask 1043456   ;;  %vm104_vm2 = vcmask 31744  }
  0x37   :  { %455 = vmatprep.subr.mxu0 %v592_v0  ;;  %457 = vmatprep.mubr.msk.f32.mxu0 %vm593_vm0, %v592_v0  ;;  %v68_v1 = vld [vmem:[#allocation2] sm:$0xf]  ;;  %v502_v4 = vld [vmem:[%s755_s3 + $0x8] sm:$0xff]   ;;  %v503_v5 = vld [vmem:[%s755_s3 + $0x10] sm:$0xff]   ;;  %vm214_vm3 = vcmask 523264   ;;  %vm409_vm4 = vcmask 23552  }
  0x38   :  { %460 = vmatprep.subr.bf16.mxu1 %v592_v0  ;;  %468 = vmatprep.mubr.msk.bf16.mxu1 %vm593_vm0, %v592_v0  ;;  %v97_v2 = vld [vmem:[%s752_s0] sm:$0xff]  ;;  %v504_v6 = vld [vmem:[%s755_s3 + $0x18] sm:$0xff]   ;;  %v506_v14 = vld [vmem:[%s757_s5 + $0x8] sm:$0xff]  }
  0x39   :  { %456 = vmatpush3.msk.msra.mxu0 %vm108_vm1, %v68_v1  ;;  %v501_v3 = vld [vmem:[%s755_s3] sm:$0xff]   ;;  %v507_v15 = vld [vmem:[%s757_s5 + $0x10] sm:$0xff]   ;;  %v508_v16 = vld [vmem:[%s757_s5 + $0x18] sm:$0xff]  }
  0x3a   :  { %458 = vmatmul.mubr.msk.f32.vlgmr.msra.gmra.mrb[0].mxu0 %vm104_vm2, %v97_v2  ;;  %472 = vmatprep.subr.bf16.mxu0 %v592_v0  ;;  %v417_v7 = vld [vmem:[#allocation4] ss:$0 sm:$0xff]  ;;  %v420_v17 = vld [vmem:[#allocation6] ss:$0 sm:$0xff]  ;;  %v510_v26 = vld [vmem:[%s759_s7 + $0x8] sm:$0xff]  }
  0x3b   :  { %480 = vmatprep.mubr.msk.bf16.mxu0 %vm593_vm0, %v592_v0  ;;  %461 = vmatpush3.bf16.msra.mxu1 %v501_v3  ;;  %v505_v13 = vld [vmem:[%s757_s5] sm:$0xff]   ;;  %v511_v27 = vld [vmem:[%s759_s7 + $0x10] sm:$0xff]   ;;  %v512_v28 = vld [vmem:[%s759_s7 + $0x18] sm:$0xff]  }
  0x3c   :  { %462 = vmatprep.subr.bf16.mxu1 %v592_v0  ;;  %473 = vmatpush3.bf16.msra.mxu0 %v505_v13  ;;  %v509_v25 = vld [vmem:[%s759_s7] sm:$0xff]  }
  0x3d   :  { %474 = vmatprep.subr.bf16.mxu0 %v592_v0  ;;  %v426_v29 = vld [vmem:[%s758_s6] ss:$0 sm:$0xff] }
  0x3e   :  { %v432_v38 = vld [vmem:[%s760_s8] ss:$0 sm:$0xff] }
  0x3f   :  { %463 = vmatpush3.bf16.msra.mxu1 %v502_v4 }
  0x40   :  { %464 = vmatprep.subr.bf16.mxu1 %v592_v0  ;;  %475 = vmatpush3.bf16.msra.mxu0 %v506_v14 }
  0x41   :  { %476 = vmatprep.subr.bf16.mxu0 %v592_v0 }
  0x43   :  { %465 = vmatpush3.bf16.msra.mxu1 %v503_v5 }
  0x44   :  { %466 = vmatprep.subr.bf16.mxu1 %v592_v0  ;;  %477 = vmatpush3.bf16.msra.mxu0 %v507_v15 }
  0x45   :  { %478 = vmatprep.subr.bf16.mxu0 %v592_v0 }
  0x47   :  { %467 = vmatpush3.bf16.msra.mxu1 %v504_v6 }
  0x48   :  { %484 = vmatprep.subr.bf16.mxu1 %v592_v0  ;;  %479 = vmatpush3.bf16.msra.mxu0 %v508_v16 }
 0x10d   :  { %v178_v8 = vpop.f32.mrb[0].mxu0 }
 0x10e   :  { %v179_v9 = vadd.f32 %v417_v7, %v178_v8  ;;  %v459_v10 = vpop.f32.mrb[1].mxu0 }
 0x110   :  { %513 = vtanh.f32 %v179_v9 }
 0x11a   :  { %v514_v11 = vpop.eup %513 }
 0x11b   :  { %v183_v12 = vpack.c.bf16 %v514_v11, %v514_v11 }
 0x11d   :  { %469 = vmatmul.mubr.msk.bf16.vlgmr.msra.gmra.mrb[0].mxu1 %vm214_vm3, %v183_v12 }
 0x11e   :  { %492 = vmatprep.mubr.msk.bf16.mxu1 %vm593_vm0, %v592_v0  ;;  %485 = vmatpush3.bf16.msra.mxu1 %v509_v25 }
 0x11f   :  { %486 = vmatprep.subr.bf16.mxu1 %v592_v0 }
 0x122   :  { %487 = vmatpush3.bf16.msra.mxu1 %v510_v26 }
 0x123   :  { %488 = vmatprep.subr.bf16.mxu1 %v592_v0 }
 0x126   :  { %489 = vmatpush3.bf16.msra.mxu1 %v511_v27 }
 0x127   :  { %490 = vmatprep.subr.bf16.mxu1 %v592_v0 }
 0x12a   :  { %491 = vmatpush3.bf16.msra.mxu1 %v512_v28 }
 0x1f0   :  { %v252_v18 = vpop.f32.mrb[0].mxu1 }
 0x1f1   :  { %v253_v19 = vadd.f32 %v420_v17, %v252_v18  ;;  %v470_v20 = vpop.f32.mrb[1].mxu1 }
 0x1f2   :  { %v255_v21 = vpop.f32.mrb[2].mxu1 }
 0x1f3   :  { %515 = vtanh.f32 %v253_v19  ;;  %v471_v22 = vpop.f32.mrb[3].mxu1 }
 0x1fd   :  { %v516_v23 = vpop.eup %515 }
 0x1fe   :  { %v259_v24 = vpack.c.bf16 %v516_v23, %v516_v23 }
 0x200   :  { %481 = vmatmul.mubr.msk.bf16.vlgmr.msra.gmra.mrb[4].mxu0 %vm214_vm3, %v259_v24 }
 0x2d3   :  { %v327_v30 = vpop.f32.mrb[4].mxu0 }
 0x2d4   :  { %v328_v31 = vadd.f32 %v426_v29, %v327_v30  ;;  %v482_v32 = vpop.f32.mrb[5].mxu0 }
 0x2d5   :  { %v330_v33 = vpop.f32.mrb[6].mxu0 }
 0x2d6   :  { %517 = vtanh.f32 %v328_v31  ;;  %v483_v34 = vpop.f32.mrb[7].mxu0 }
 0x2e0   :  { %v518_v35 = vpop.eup %517 }
 0x2e1   :  { %v334_v36 = vadd.f32 %v518_v35, %v514_v11 }
 0x2e3   :  { %v335_v37 = vpack.c.bf16 %v334_v36, %v334_v36 }
 0x2e5   :  { %493 = vmatmul.mubr.msk.bf16.vlgmr.msra.gmra.mrb[4].mxu1 %vm214_vm3, %v335_v37 }
 0x3b8   :  { %v403_v39 = vpop.f32.mrb[4].mxu1 }
 0x3b9   :  { %v404_v40 = vadd.f32 %v432_v38, %v403_v39  ;;  %v494_v41 = vpop.f32.mrb[5].mxu1 }
 0x3ba   :  { %v406_v42 = vpop.f32.mrb[6].mxu1 }
 0x3bb   :  { %410 = vst.msk [vmem:[%s761_s9] sm:$0xff] %vm409_vm4, %v404_v40  ;;  %v495_v43 = vpop.f32.mrb[7].mxu1 }
 0x3bc   :  { %415 = vsyncpa [#allocation3], 1 }
 0x3bd   :  { %416 = vsyncpa [#allocation5], 1 }

</bundles_post_ra>
